<compile_context>
chip_gen: v7x
topology: tpu7x:2x2x1
jax: 0.10.0
libtpu: 0.0.40
codegen_flags: <defaults>
</compile_context>

<pallas_src>
import functools

import jax
import jax.numpy as jnp
from jax import lax
from jax.experimental import pallas as pl
from jax.experimental.pallas import tpu as pltpu


def _round_up(x, m):
    return (x + m - 1) // m * m


def _pad2(a, rows, cols):
    if a.shape == (rows, cols):          # skip the pad (extra HBM RW) if aligned
        return a
    return jnp.pad(a, ((0, rows - a.shape[0]), (0, cols - a.shape[1])))


def _vmem_budget_bytes():
    """Returns (vmem_limit_bytes for CompilerParams, tile working-set budget)."""
    try:
        cap = int(pltpu.get_tpu_info().vmem_capacity_bytes)
    except Exception:
        cap = 64 * 1024 * 1024           # assume worst case (v7x: 64 MiB / TC)
    limit = int(cap * 0.75)              # headroom for Mosaic internal scratch
    return limit, int(limit * 0.8)


def _tiling(B, d_in, d_out, tb, tn, tk, w_bytes, x_bytes, ws_budget):
    """Pad dims to (8,128)-friendly sizes, pick MXU-shaped tiles that fit the
    per-generation VMEM budget, and give the parallel grid axes >=2 blocks
    when possible (v7x megacore)."""
    B_p = _round_up(B, 8)
    d_in_p = _round_up(d_in, 128)
    d_out_p = _round_up(d_out, 128)

    tb = B_p if tb is None else tb       # one batch tile whenever it fits
    tn = 512 if tn is None else tn
    tk = 1024 if tk is None else tk
    tb = max(8, min(_round_up(tb, 8), B_p, 1024))
    tn = max(128, min(_round_up(tn, 128), d_out_p))
    tk = max(128, min(_round_up(tk, 128), d_in_p))

    def working_set(tb_, tn_, tk_):
        x_b = 2 * tb_ * tk_ * x_bytes            # double-buffered x tile
        w_b = 2 * 3 * tn_ * tk_ * w_bytes        # wm/ws/wn tiles, double-buffered
        o_b = 2 * tb_ * tn_ * 4                  # f32 output block
        tmp = tn_ * tk_ * 4                      # materialized stoch_w f32 temp
        return x_b + w_b + o_b + tmp

    while working_set(tb, tn, tk) > ws_budget and tk > 128:
        tk = max(128, (tk // 2) // 128 * 128)
    while working_set(tb, tn, tk) > ws_budget and tn > 128:
        tn = max(128, (tn // 2) // 128 * 128)
    while working_set(tb, tn, tk) > ws_budget and tb > 8:
        tb = max(8, (tb // 2) // 8 * 8)

    B_p = _round_up(B_p, tb)
    d_out_p = _round_up(d_out_p, tn)
    d_in_p = _round_up(d_in_p, tk)

    # Ensure >=2 blocks on the parallel axes so both v7x TensorCores are used.
    if (B_p // tb) * (d_out_p // tn) < 2:
        if B_p >= 16:                              # split the (cheap) batch axis
            tb = _round_up(-(-B_p // 2), 8)
            B_p = _round_up(B_p, tb)
        elif d_out_p >= 256:                       # otherwise split d_out
            tn = _round_up(-(-d_out_p // 2), 128)
            d_out_p = _round_up(d_out_p, tn)

    return B_p, d_in_p, d_out_p, tb, tn, tk


# ------------------------------ kernel body ---------------------------------

def _stochlin_kernel(x_ref, wm_ref, ws_ref, wn_ref, b_ref, o_ref, *, mxu_dtype):
    """One (batch-tile i, out-tile j, k) step of y = x @ stoch_w.T + stoch_b.

    The output block index ignores k, so o_ref stays resident in VMEM across
    the whole d_in reduction and doubles as the f32 accumulator."""
    k = pl.program_id(2)
    f32 = jnp.float32

    @pl.when(k == 0)
    def _():
        o_ref[...] = jnp.zeros_like(o_ref)

    # Reparameterized stochastic weight tile, built in f32 on the VPU/EUP
    # (the weight params may be stored as bf16 in HBM).
    stoch_w = (wm_ref[...].astype(f32)
               + wn_ref[...].astype(f32) * jnp.exp(ws_ref[...].astype(f32)))

    # x(tb, tk) contracted with stoch_w(tn, tk) over d_in -> (tb, tn).
    # dot_general consumes the weight tile in its natural (d_out, d_in) layout
    # (MXU transposed-RHS path, no materialized transpose); bf16 operands hit
    # the native MXU rate while accumulation stays f32.
    o_ref[...] += lax.dot_general(
        x_ref[...].astype(mxu_dtype), stoch_w.astype(mxu_dtype),
        dimension_numbers=(((1,), (1,)), ((), ())),
        preferred_element_type=f32)

    @pl.when(k == pl.num_programs(2) - 1)
    def _():
        b = b_ref[...].astype(f32)                              # (3, tn)
        stoch_b = b[0:1, :] + b[2:3, :] * jnp.exp(b[1:2, :])    # (1, tn)
        o_ref[...] += stoch_b


# -------------------------------- wrapper ------------------------------------

def stoch_lin_forward(x, weight_mean, weight_scale, weight_noise,
                      bias_mean, bias_scale, bias_noise,
                      *, tb=None, tn=None, tk=None,
                      mxu_dtype=jnp.bfloat16, param_dtype=None):
    """y = x @ (weight_mean + weight_noise*exp(weight_scale)).T
           + (bias_mean + bias_noise*exp(bias_scale))

    param_dtype : HBM storage dtype of the three weight-sized operands
                  (defaults to mxu_dtype; bf16 halves the dominant streams).
    mxu_dtype   : operand dtype fed to the MXU (accumulation is always f32).
    """
    if param_dtype is None:
        param_dtype = mxu_dtype
    B, d_in = x.shape
    d_out = weight_mean.shape[0]

    w_bytes = jnp.dtype(param_dtype).itemsize
    x_bytes = jnp.dtype(x.dtype).itemsize
    vmem_limit, ws_budget = _vmem_budget_bytes()
    B_p, d_in_p, d_out_p, tb, tn, tk = _tiling(
        B, d_in, d_out, tb, tn, tk, w_bytes, x_bytes, ws_budget)

    xp = _pad2(x, B_p, d_in_p)
    wm = _pad2(weight_mean.astype(param_dtype), d_out_p, d_in_p)
    ws = _pad2(weight_scale.astype(param_dtype), d_out_p, d_in_p)
    wn = _pad2(weight_noise.astype(param_dtype), d_out_p, d_in_p)
    bias = jnp.stack([bias_mean, bias_scale, bias_noise], axis=0).astype(jnp.float32)
    bias = _pad2(bias, 3, d_out_p)

    grid = (B_p // tb, d_out_p // tn, d_in_p // tk)
    n_i, n_j, _ = grid

    # Weight-sized streams are re-fetched once per batch tile (index maps
    # ignore i); x is re-fetched once per output tile (index map ignores j).
    cost = pl.CostEstimate(
        flops=int(2 * B_p * d_in_p * d_out_p),
        transcendentals=int(n_i * d_out_p * d_in_p + n_i * n_j * d_out_p),
        bytes_accessed=int(n_j * xp.size * x_bytes
                           + n_i * (wm.size + ws.size + wn.size) * w_bytes
                           + n_i * bias.size * 4
                           + B_p * d_out_p * 4))

    kernel = functools.partial(_stochlin_kernel, mxu_dtype=mxu_dtype)
    out = pl.pallas_call(
        kernel,
        out_shape=jax.ShapeDtypeStruct((B_p, d_out_p), jnp.float32),
        grid_spec=pltpu.PrefetchScalarGridSpec(
            num_scalar_prefetch=0,
            grid=grid,
            in_specs=[
                pl.BlockSpec((tb, tk), lambda i, j, k: (i, k)),   # x
                pl.BlockSpec((tn, tk), lambda i, j, k: (j, k)),   # weight_mean
                pl.BlockSpec((tn, tk), lambda i, j, k: (j, k)),   # weight_scale
                pl.BlockSpec((tn, tk), lambda i, j, k: (j, k)),   # weight_noise
                pl.BlockSpec((3, tn), lambda i, j, k: (0, j)),    # packed bias (resident over k)
            ],
            out_specs=pl.BlockSpec((tb, tn), lambda i, j, k: (i, j)),
        ),
        compiler_params=pltpu.CompilerParams(
            dimension_semantics=("parallel", "parallel", "arbitrary"),
            vmem_limit_bytes=vmem_limit),
        cost_estimate=cost,
    )(xp, wm, ws, wn, bias)

    out = out[:B, :d_out]
    return out if x.dtype == jnp.float32 else out.astype(x.dtype)


def reference_forward(x, weight_mean, weight_scale, weight_noise,
                      bias_mean, bias_scale, bias_noise,
                      mxu_dtype=jnp.float32):
    f32 = jnp.float32
    sw = (weight_mean.astype(f32)
          + weight_noise.astype(f32) * jnp.exp(weight_scale.astype(f32)))
    sb = (bias_mean.astype(f32)
          + bias_noise.astype(f32) * jnp.exp(bias_scale.astype(f32)))
    y = lax.dot_general(x.astype(mxu_dtype), sw.astype(mxu_dtype),
                        dimension_numbers=(((1,), (1,)), ((), ())),
                        preferred_element_type=f32)
    return y + sb


if __name__ == "__main__":
    # --- StochLinConfig-style toy config -------------------------------------
    d_in, d_out, batch = 32, 32, 8
    norm_mean, norm_stdv = 0.0, 0.1
    trunc_min, trunc_max = -0.2, 0.2
    scale = -3.0       # config.scale  (stdv = exp(scale))
    bias = 0.0         # config.bias

    key = jax.random.PRNGKey(0)
    k_wm, k_wn, k_bn, k_x = jax.random.split(key, 4)

    lower = (trunc_min - norm_mean) / norm_stdv
    upper = (trunc_max - norm_mean) / norm_stdv
    weight_mean = (jax.random.truncated_normal(
        k_wm, lower, upper, (d_out, d_in), dtype=jnp.float32) * norm_stdv + norm_mean)
    weight_scale = jnp.full((d_out, d_in), scale, dtype=jnp.float32)
    bias_mean = jnp.full((d_out,), bias, dtype=jnp.float32)
    bias_scale = jnp.full((d_out,), scale, dtype=jnp.float32)

    # Noise for the stochastic forward (randn_like in PyTorch), sampled here so
    # the kernel can be checked exactly against the pure-JAX reference.
    weight_noise = jax.random.normal(k_wn, (d_out, d_in), dtype=jnp.float32)
    bias_noise = jax.random.normal(k_bn, (d_out,), dtype=jnp.float32)
    x = jax.random.normal(k_x, (batch, d_in), dtype=jnp.float32)

    # 1) f32 path: exact check vs. the f32 reference.
    out = jax.block_until_ready(stoch_lin_forward(
        x, weight_mean, weight_scale, weight_noise,
        bias_mean, bias_scale, bias_noise,
        mxu_dtype=jnp.float32, param_dtype=jnp.float32))
    ref = reference_forward(x, weight_mean, weight_scale, weight_noise,
                            bias_mean, bias_scale, bias_noise,
                            mxu_dtype=jnp.float32)
    assert out.shape == (batch, d_out)
    assert jnp.allclose(out, ref, atol=1e-4, rtol=1e-4)

    # 2) bf16 production path (default large tiles): like-for-like check
    #    against a reference that also stores the weight params in bf16 and
    #    feeds bf16 MXU operands with f32 accumulation.
    out_bf = jax.block_until_ready(stoch_lin_forward(
        x, weight_mean, weight_scale, weight_noise,
        bias_mean, bias_scale, bias_noise))
    ref_bf = reference_forward(
        x, weight_mean.astype(jnp.bfloat16), weight_scale.astype(jnp.bfloat16),
        weight_noise.astype(jnp.bfloat16),
        bias_mean, bias_scale, bias_noise, mxu_dtype=jnp.bfloat16)
    assert jnp.allclose(out_bf, ref_bf, atol=2e-4, rtol=2e-4)
    # ...and it still tracks the full-f32 reference at bf16-level accuracy.
    assert jnp.allclose(out_bf, ref, atol=5e-2, rtol=5e-2)

    # 3) multi-tile problem: exercises batch + output tiling, the d_in
    #    reduction carry into the resident output block, and padding.
    d_in2, d_out2, batch2 = 384, 320, 24
    kk = jax.random.split(jax.random.PRNGKey(1), 5)
    wm2 = jax.random.normal(kk[0], (d_out2, d_in2), jnp.float32) * 0.05
    wsc2 = jnp.full((d_out2, d_in2), -2.0, jnp.float32)
    wn2 = jax.random.normal(kk[1], (d_out2, d_in2), jnp.float32)
    bm2 = jax.random.normal(kk[2], (d_out2,), jnp.float32) * 0.05
    bsc2 = jnp.full((d_out2,), -2.0, jnp.float32)
    bn2 = jax.random.normal(kk[3], (d_out2,), jnp.float32)
    x2 = jax.random.normal(kk[4], (batch2, d_in2), jnp.float32)

    out2 = jax.block_until_ready(stoch_lin_forward(
        x2, wm2, wsc2, wn2, bm2, bsc2, bn2, tb=16, tn=128, tk=128))
    ref2 = reference_forward(
        x2, wm2.astype(jnp.bfloat16), wsc2.astype(jnp.bfloat16),
        wn2.astype(jnp.bfloat16), bm2, bsc2, bn2, mxu_dtype=jnp.bfloat16)
    assert out2.shape == (batch2, d_out2)
    assert jnp.allclose(out2, ref2, atol=1e-3, rtol=1e-3)

    print("KERNEL_OK")
</pallas_src>

<mosaic_0001>
module attributes {stable_mosaic.version = 11 : i64} {
  func.func @_stochlin_kernel(%arg0: i32, %arg1: i32, %arg2: i32, %arg3: memref<8x128xf32, #tpu.memory_space<vmem>>, %arg4: memref<128x128xf32, #tpu.memory_space<vmem>>, %arg5: memref<128x128xf32, #tpu.memory_space<vmem>>, %arg6: memref<128x128xf32, #tpu.memory_space<vmem>>, %arg7: memref<3x128xf32, #tpu.memory_space<vmem>>, %arg8: memref<8x128xf32, #tpu.memory_space<vmem>>) attributes {dimension_semantics = [#tpu.dimension_semantics<parallel>, #tpu.dimension_semantics<parallel>, #tpu.dimension_semantics<arbitrary>], iteration_bounds = array<i64: 1, 1, 1>, scalar_prefetch = 0 : i64, scratch_operands = 0 : i64, tpu.core_type = #tpu.core_type<tc>, window_params = [{transform_indices = @transform_0, window_bounds = array<i64: 8, 128>}, {transform_indices = @transform_1, window_bounds = array<i64: 128, 128>}, {transform_indices = @transform_2, window_bounds = array<i64: 128, 128>}, {transform_indices = @transform_3, window_bounds = array<i64: 128, 128>}, {transform_indices = @transform_4, window_bounds = array<i64: 3, 128>}, {transform_indices = @transform_5, window_bounds = array<i64: 8, 128>}]} {
    %c0_i32 = arith.constant 0 : i32
    %0 = arith.cmpi eq, %arg2, %c0_i32 : i32
    %1 = arith.extui %0 : i1 to i32
    %c0_i32_0 = arith.constant 0 : i32
    %2 = arith.cmpi ne, %1, %c0_i32_0 : i32
    scf.if %2 {
      %cst_14 = arith.constant 0.000000e+00 : f32
      %17 = vector.broadcast %cst_14 : f32 to vector<8x128xf32>
      %c0_15 = arith.constant 0 : index
      %c0_16 = arith.constant 0 : index
      %18 = vector.load %arg8[%c0_15, %c0_16] : memref<8x128xf32, #tpu.memory_space<vmem>>, vector<8x128xf32>
      tpu.vector_store %arg8[%c0_15, %c0_16], %17 {strides = array<i32>} : memref<8x128xf32, #tpu.memory_space<vmem>>, vector<8x128xf32>,
    } else {
    }
    %c0 = arith.constant 0 : index
    %c0_1 = arith.constant 0 : index
    %3 = vector.load %arg4[%c0, %c0_1] : memref<128x128xf32, #tpu.memory_space<vmem>>, vector<128x128xf32>
    %c0_2 = arith.constant 0 : index
    %c0_3 = arith.constant 0 : index
    %4 = vector.load %arg6[%c0_2, %c0_3] : memref<128x128xf32, #tpu.memory_space<vmem>>, vector<128x128xf32>
    %c0_4 = arith.constant 0 : index
    %c0_5 = arith.constant 0 : index
    %5 = vector.load %arg5[%c0_4, %c0_5] : memref<128x128xf32, #tpu.memory_space<vmem>>, vector<128x128xf32>
    %6 = math.exp %5 : vector<128x128xf32>
    %7 = arith.mulf %4, %6 : vector<128x128xf32>
    %8 = arith.addf %3, %7 : vector<128x128xf32>
    %c0_6 = arith.constant 0 : index
    %c0_7 = arith.constant 0 : index
    %9 = vector.load %arg8[%c0_6, %c0_7] : memref<8x128xf32, #tpu.memory_space<vmem>>, vector<8x128xf32>
    %c0_8 = arith.constant 0 : index
    %c0_9 = arith.constant 0 : index
    %10 = vector.load %arg3[%c0_8, %c0_9] : memref<8x128xf32, #tpu.memory_space<vmem>>, vector<8x128xf32>
    %cst = arith.constant dense<0.000000e+00> : vector<8x128xf32>
    %11 = tpu.matmul %10, %8, %cst {dimension_numbers = #tpu.dot_dimension_numbers<[1], [1], [0], [0], [0, 0, 1, 0], [], []>} : vector<8x128xf32>, vector<128x128xf32>, vector<8x128xf32> -> vector<8x128xf32>
    %12 = arith.addf %9, %11 : vector<8x128xf32>
    %c0_10 = arith.constant 0 : index
    %c0_11 = arith.constant 0 : index
    %13 = vector.load %arg8[%c0_10, %c0_11] : memref<8x128xf32, #tpu.memory_space<vmem>>, vector<8x128xf32>
    tpu.vector_store %arg8[%c0_10, %c0_11], %12 {strides = array<i32>} : memref<8x128xf32, #tpu.memory_space<vmem>>, vector<8x128xf32>,
    %c0_i32_12 = arith.constant 0 : i32
    %14 = arith.cmpi eq, %arg2, %c0_i32_12 : i32
    %15 = arith.extui %14 : i1 to i32
    %c0_i32_13 = arith.constant 0 : i32
    %16 = arith.cmpi ne, %15, %c0_i32_13 : i32
    scf.if %16 {
      %c0_14 = arith.constant 0 : index
      %c0_15 = arith.constant 0 : index
      %17 = vector.load %arg7[%c0_14, %c0_15] : memref<3x128xf32, #tpu.memory_space<vmem>>, vector<3x128xf32>
      %18 = vector.extract_strided_slice %17 {offsets = [0, 0], sizes = [1, 128], strides = [1, 1]} : vector<3x128xf32> to vector<1x128xf32>
      %19 = vector.extract_strided_slice %17 {offsets = [2, 0], sizes = [1, 128], strides = [1, 1]} : vector<3x128xf32> to vector<1x128xf32>
      %20 = vector.extract_strided_slice %17 {offsets = [1, 0], sizes = [1, 128], strides = [1, 1]} : vector<3x128xf32> to vector<1x128xf32>
      %21 = math.exp %20 : vector<1x128xf32>
      %22 = arith.mulf %19, %21 : vector<1x128xf32>
      %23 = arith.addf %18, %22 : vector<1x128xf32>
      %c0_16 = arith.constant 0 : index
      %c0_17 = arith.constant 0 : index
      %24 = vector.load %arg8[%c0_16, %c0_17] : memref<8x128xf32, #tpu.memory_space<vmem>>, vector<8x128xf32>
      %25 = vector.broadcast %23 : vector<1x128xf32> to vector<8x128xf32>
      %26 = arith.addf %24, %25 : vector<8x128xf32>
      %c0_18 = arith.constant 0 : index
      %c0_19 = arith.constant 0 : index
      %27 = vector.load %arg8[%c0_18, %c0_19] : memref<8x128xf32, #tpu.memory_space<vmem>>, vector<8x128xf32>
      tpu.vector_store %arg8[%c0_18, %c0_19], %26 {strides = array<i32>} : memref<8x128xf32, #tpu.memory_space<vmem>>, vector<8x128xf32>,
    } else {
    }
    return
  }
  func.func @transform_0(%arg0: i32, %arg1: i32, %arg2: i32) -> (i32, i32) {
    %c0_i32 = arith.constant 0 : i32
    return %arg0, %arg2 : i32, i32
  }
  func.func @transform_1(%arg0: i32, %arg1: i32, %arg2: i32) -> (i32, i32) {
    %c0_i32 = arith.constant 0 : i32
    return %arg1, %arg2 : i32, i32
  }
  func.func @transform_2(%arg0: i32, %arg1: i32, %arg2: i32) -> (i32, i32) {
    %c0_i32 = arith.constant 0 : i32
    return %arg1, %arg2 : i32, i32
  }
  func.func @transform_3(%arg0: i32, %arg1: i32, %arg2: i32) -> (i32, i32) {
    %c0_i32 = arith.constant 0 : i32
    return %arg1, %arg2 : i32, i32
  }
  func.func @transform_4(%arg0: i32, %arg1: i32, %arg2: i32) -> (i32, i32) {
    %c0_i32 = arith.constant 0 : i32
    %c0_i32_0 = arith.constant 0 : i32
    return %c0_i32, %arg1 : i32, i32
  }
  func.func @transform_5(%arg0: i32, %arg1: i32, %arg2: i32) -> (i32, i32) {
    %c0_i32 = arith.constant 0 : i32
    return %arg0, %arg1 : i32, i32
  }
}

</mosaic_0001>

<bundles_post_ra>
// kernel: tpu_custom_call.1
= control target key start
LH: loop header
LB: loop body
LE: loop exit
PB: predicated region body
PF: predicated region fallthrough
CT: control target
= control target key end

     0   :  { %10 = vsyncpa [#allocation3], 0  ;;  %s661_s0 = inlined_call_operand.hbm [shape: f32[8,128], index: 0, kind: input, shape index: {}]   ;;  %s662_s1 = inlined_call_operand.hbm [shape: f32[128,128], index: 1, kind: input, shape index: {}]   ;;  %s663_s2 = inlined_call_operand.hbm [shape: f32[128,128], index: 2, kind: input, shape index: {}]   ;;  %s664_s3 = inlined_call_operand.hbm [shape: f32[128,128], index: 3, kind: input, shape index: {}]   ;;  %s665_s4 = inlined_call_operand.vmem [shape: f32[3,128], index: 4, kind: input, shape index: {}]   ;;  %s666_s5 = inlined_call_operand.hbm [shape: f32[8,128], index: 5, kind: output, shape index: {}]  }
   0x1   :  { %11 = vsyncpa [#allocation6], 0 }
   0x2   :  { %12 = vsyncpa [#allocation9], 0 }
   0x3   :  { %13 = vsyncpa [#allocation4], 0  ;;  %s541_s18 = smov [#allocation5]   ;;  %s423_s22 = scalar_lea.hbm %s662_s1, 2048 }
   0x4   :  { %s29_s19 = sshll.u32 %s541_s18, 4  ;;  %p424_p0 = scmp.ne.s32.totalorder %s662_s1, %s423_s22  ;;  %s30_s19 = int_to_ptr.vmem [resolvable:$true] %s29_s19 }
   0x5   :  { %p427_p1 = scmp.lt.u32.totalorder %s423_s22, %s662_s1 }
   0x7   :  { %p429_p2 = pnand %p427_p1, %p424_p0 }
   0x9   :  { %432 = shalt.err (!%p429_p2)
}
   0xa   :  { %s433_s27 = scalar_lea.vmem %s30_s19, 2048  ;;  %p438_p4 = scmp.lt.s32.totalorder %s30_s19, %s30_s19 }
   0xb   :  { %p434_p3 = scmp.ne.s32.totalorder %s30_s19, %s433_s27  ;;  %p439_p5 = scmp.lt.s32.totalorder %s433_s27, %s433_s27 }
   0xd   :  { %p440_p6 = por %p439_p5, %p438_p4 }
   0xf   :  { %p441_p7 = pnand %p440_p6, %p434_p3 }
  0x11   :  { %444 = shalt.err (!%p441_p7)
}
  0x12   :  { %s542_s28 = smov 128   ;;  %s543_s29 = smov 8  }
  0x13   :  { %35 = dma.hbm_to_vmem [thread:$0]  %s662_s1, 2048, %s30_s19, [#allocation6], %s542_s28, %s542_s28, %s543_s29  }
  0x14   :  { %s544_s7 = smov [#allocation2]   ;;  %s545_s9 = smov [#allocation7]  }
  0x15   :  { %s20_s8 = sshll.u32 %s544_s7, 4  ;;  %s41_s10 = sshll.u32 %s545_s9, 4  ;;  %s21_s8 = int_to_ptr.vmem [resolvable:$true] %s20_s8  ;;  %s42_s10 = int_to_ptr.vmem [resolvable:$true] %s41_s10 }
  0x16   :  { %s445_s13 = scalar_lea.hbm %s661_s0, 128 }
  0x17   :  { %p446_p8 = scmp.ne.s32.totalorder %s661_s0, %s445_s13  ;;  %p449_p9 = scmp.lt.u32.totalorder %s445_s13, %s661_s0 }
  0x19   :  { %p451_p10 = pnand %p449_p9, %p446_p8 }
  0x1b   :  { %454 = shalt.err (!%p451_p10)
}
  0x1c   :  { %s455_s1 = scalar_lea.vmem %s21_s8, 128  ;;  %p460_p12 = scmp.lt.s32.totalorder %s21_s8, %s21_s8 }
  0x1d   :  { %p456_p11 = scmp.ne.s32.totalorder %s21_s8, %s455_s1  ;;  %p461_p13 = scmp.lt.s32.totalorder %s455_s1, %s455_s1 }
  0x1f   :  { %p462_p0 = por %p461_p13, %p460_p12 }
  0x21   :  { %p463_p1 = pnand %p462_p0, %p456_p11 }
  0x23   :  { %466 = shalt.err (!%p463_p1)
}
  0x24   :  { %23 = dma.hbm_to_vmem [thread:$0]  %s661_s0, 128, %s21_s8, [#allocation3]  }
  0x25   :  { %s467_s22 = scalar_lea.hbm %s663_s2, 2048 }
  0x26   :  { %p468_p2 = scmp.ne.s32.totalorder %s663_s2, %s467_s22  ;;  %p471_p3 = scmp.lt.u32.totalorder %s467_s22, %s663_s2 }
  0x28   :  { %p473_p4 = pnand %p471_p3, %p468_p2 }
  0x2a   :  { %476 = shalt.err (!%p473_p4)
}
  0x2b   :  { %s477_s27 = scalar_lea.vmem %s42_s10, 2048  ;;  %p482_p6 = scmp.lt.s32.totalorder %s42_s10, %s42_s10 }
  0x2c   :  { %p478_p5 = scmp.ne.s32.totalorder %s42_s10, %s477_s27  ;;  %p483_p7 = scmp.lt.s32.totalorder %s477_s27, %s477_s27 }
  0x2e   :  { %p484_p8 = por %p483_p7, %p482_p6 }
  0x30   :  { %p485_p9 = pnand %p484_p8, %p478_p5 }
  0x32   :  { %488 = shalt.err (!%p485_p9)
}
  0x33   :  { %47 = dma.hbm_to_vmem [thread:$0]  %s663_s2, 2048, %s42_s10, [#allocation6], %s542_s28, %s542_s28, %s543_s29  }
  0x34   :  { %s546_s6 = smov [#allocation8]   ;;  %s489_s11 = scalar_lea.hbm %s664_s3, 2048 }
  0x35   :  { %s53_s7 = sshll.u32 %s546_s6, 4  ;;  %p490_p10 = scmp.ne.s32.totalorder %s664_s3, %s489_s11  ;;  %s54_s7 = int_to_ptr.vmem [resolvable:$true] %s53_s7 }
  0x36   :  { %p493_p11 = scmp.lt.u32.totalorder %s489_s11, %s664_s3 }
  0x38   :  { %p495_p12 = pnand %p493_p11, %p490_p10 }
  0x3a   :  { %498 = shalt.err (!%p495_p12)
}
  0x3b   :  { %s499_s16 = scalar_lea.vmem %s54_s7, 2048  ;;  %p504_p0 = scmp.lt.s32.totalorder %s54_s7, %s54_s7 }
  0x3c   :  { %p500_p13 = scmp.ne.s32.totalorder %s54_s7, %s499_s16  ;;  %p505_p1 = scmp.lt.s32.totalorder %s499_s16, %s499_s16 }
  0x3e   :  { %p506_p2 = por %p505_p1, %p504_p0 }
  0x40   :  { %p507_p3 = pnand %p506_p2, %p500_p13 }
  0x42   :  { %510 = shalt.err (!%p507_p3)
}
  0x43   :  { %59 = dma.hbm_to_vmem [thread:$0]  %s664_s3, 2048, %s54_s7, [#allocation9], %s542_s28, %s542_s28, %s543_s29  }
  0x44   :  { %533 = dma.done.wait [#allocation3], 128  }
  0x45   :  { %534 = vsyncadd [#allocation3], 4294967168 }
  0x46   :  { %535 = dma.done.wait [#allocation6], 4096  }
  0x47   :  { %536 = vsyncadd [#allocation6], 4294963200 }
  0x48   :  { %537 = dma.done.wait [#allocation9], 2048  }
  0x49   :  { %538 = vsyncadd [#allocation9], 4294965248  ;;  %v547_v0 = vmov 0.0|0.0   ;;  %vm548_vm0 = vmmov 0   ;;  %v549_v1 = vmov 0.0   ;;  %v111_v2 = vld [vmem:[#allocation7] sm:$0xff] }
  0x4a   :  { %355 = vmatprep.subr.bf16.mxu0 %v547_v0  ;;  %352 = vmatprep.mubr.msk.f32.mxu0 %vm548_vm0, %v549_v1  ;;  %v112_v3 = vld [vmem:[#allocation7 + $0x8] sm:$0xff]  ;;  %v127_v4 = vmul.f32 1.442695, %v111_v2  ;;  %v113_v6 = vld [vmem:[#allocation7 + $0x10] sm:$0xff]  ;;  %v114_v7 = vld [vmem:[#allocation7 + $0x18] sm:$0xff]  ;;  %s550_s29 = smov [#allocation10]  }
  0x4b   :  { %v129_v5 = vmul.f32 1.442695, %v112_v3  ;;  %v131_v8 = vmul.f32 1.442695, %v113_v6  ;;  %v133_v9 = vmul.f32 1.442695, %v114_v7 }
  0x4c   :  { %389 = vpow2.f32 %v127_v4  ;;  %v115_v10 = vld [vmem:[#allocation7 + $0x20] sm:$0xff]  ;;  %v116_v11 = vld [vmem:[#allocation7 + $0x28] sm:$0xff]  ;;  %v117_v16 = vld [vmem:[#allocation7 + $0x30] sm:$0xff]  ;;  %s292_s17 = sshll.u32 %s550_s29, 4  ;;  %s293_s17 = int_to_ptr.vmem [resolvable:$true] %s292_s17 }
  0x4d   :  { %391 = vpow2.f32 %v129_v5  ;;  %v135_v12 = vmul.f32 1.442695, %v115_v10  ;;  %v137_v13 = vmul.f32 1.442695, %v116_v11  ;;  %v95_v14 = vld [vmem:[#allocation8] sm:$0xff]  ;;  %v96_v15 = vld [vmem:[#allocation8 + $0x8] sm:$0xff]  ;;  %p516_p5 = scmp.lt.s32.totalorder %s293_s17, %s293_s17 }
  0x4e   :  { %393 = vpow2.f32 %v131_v8  ;;  %v79_v18 = vld [vmem:[#allocation5] sm:$0xff]  ;;  %v118_v19 = vld [vmem:[#allocation7 + $0x38] sm:$0xff]  ;;  %v80_v21 = vld [vmem:[#allocation5 + $0x8] sm:$0xff]  ;;  %v139_v27 = vmul.f32 1.442695, %v117_v16  ;;  %s511_s1 = scalar_lea.vmem %s293_s17, 128 }
  0x4f   :  { %395 = vpow2.f32 %v133_v9  ;;  %v97_v23 = vld [vmem:[#allocation8 + $0x10] sm:$0xff]  ;;  %v98_v24 = vld [vmem:[#allocation8 + $0x18] sm:$0xff]  ;;  %v141_v30 = vmul.f32 1.442695, %v118_v19  ;;  %v119_v37 = vld [vmem:[#allocation7 + $0x40] sm:$0xff]  ;;  %p512_p4 = scmp.ne.s32.totalorder %s293_s17, %s511_s1  ;;  %p517_p6 = scmp.lt.s32.totalorder %s511_s1, %s511_s1 }
  0x50   :  { %397 = vpow2.f32 %v135_v12  ;;  %v81_v34 = vld [vmem:[#allocation5 + $0x10] sm:$0xff]  ;;  %v82_v35 = vld [vmem:[#allocation5 + $0x18] sm:$0xff]  ;;  %v120_v41 = vld [vmem:[#allocation7 + $0x48] sm:$0xff]  ;;  %v143_v45 = vmul.f32 1.442695, %v119_v37 }
  0x51   :  { %399 = vpow2.f32 %v137_v13  ;;  %v99_v43 = vld [vmem:[#allocation8 + $0x20] sm:$0xff]  ;;  %v100_v44 = vld [vmem:[#allocation8 + $0x28] sm:$0xff]  ;;  %v145_v46 = vmul.f32 1.442695, %v120_v41  ;;  %v121_v52 = vld [vmem:[#allocation7 + $0x50] sm:$0xff]  ;;  %p518_p7 = por %p517_p6, %p516_p5 }
  0x52   :  { %401 = vpow2.f32 %v139_v27  ;;  %v83_v50 = vld [vmem:[#allocation5 + $0x20] sm:$0xff]  ;;  %v84_v51 = vld [vmem:[#allocation5 + $0x28] sm:$0xff]  ;;  %v122_v56 = vld [vmem:[#allocation7 + $0x58] sm:$0xff]  ;;  %v147_v60 = vmul.f32 1.442695, %v121_v52 }
  0x53   :  { %403 = vpow2.f32 %v141_v30  ;;  %v101_v58 = vld [vmem:[#allocation8 + $0x30] sm:$0xff]  ;;  %v102_v59 = vld [vmem:[#allocation8 + $0x38] sm:$0xff]  ;;  %v149_v61 = vmul.f32 1.442695, %v122_v56  ;;  %v123_v4 = vld [vmem:[#allocation7 + $0x60] sm:$0xff]  ;;  %p519_p8 = pnand %p518_p7, %p512_p4 }
  0x54   :  { %405 = vpow2.f32 %v143_v45  ;;  %v85_v2 = vld [vmem:[#allocation5 + $0x30] sm:$0xff]  ;;  %v86_v3 = vld [vmem:[#allocation5 + $0x38] sm:$0xff]  ;;  %v124_v8 = vld [vmem:[#allocation7 + $0x68] sm:$0xff]  ;;  %v151_v12 = vmul.f32 1.442695, %v123_v4 }
  0x55   :  { %407 = vpow2.f32 %v145_v46  ;;  %v103_v10 = vld [vmem:[#allocation8 + $0x40] sm:$0xff]  ;;  %v104_v11 = vld [vmem:[#allocation8 + $0x48] sm:$0xff]  ;;  %v153_v13 = vmul.f32 1.442695, %v124_v8  ;;  %v125_v19 = vld [vmem:[#allocation7 + $0x70] sm:$0xff] }
  0x56   :  { %v390_v17 = vpop.eup %389  ;;  %409 = vpow2.f32 %v147_v60  ;;  %v155_v27 = vmul.f32 1.442695, %v125_v19  ;;  %v268_v60 = vld [vmem:[%s665_s4] sm:$0x7] }
  0x57   :  { %v392_v20 = vpop.eup %391  ;;  %v159_v22 = vmul.f32 %v390_v17, %v95_v14  ;;  %411 = vpow2.f32 %v149_v61  ;;  %v87_v17 = vld [vmem:[#allocation5 + $0x40] sm:$0xff]  ;;  %v269_v61 = vmul.f32 1.442695, %v268_v60 }
  0x58   :  { %v394_v25 = vpop.eup %393  ;;  %v160_v26 = vmul.f32 %v392_v20, %v96_v15  ;;  %413 = vpow2.f32 %v151_v12 }
  0x59   :  { %v396_v28 = vpop.eup %395  ;;  %v175_v29 = vadd.f32 %v159_v22, %v79_v18  ;;  %v161_v32 = vmul.f32 %v394_v25, %v97_v23  ;;  %v88_v18 = vld [vmem:[#allocation5 + $0x48] sm:$0xff]  ;;  %415 = vpow2.f32 %v153_v13  ;;  %v126_v23 = vld [vmem:[#allocation7 + $0x78] sm:$0xff]  ;;  %v105_v25 = vld [vmem:[#allocation8 + $0x50] sm:$0xff] }
  0x5a   :  { %v176_v31 = vadd.f32 %v160_v26, %v80_v21  ;;  %v162_v33 = vmul.f32 %v396_v28, %v98_v24  ;;  %v398_v38 = vpop.eup %397  ;;  %v106_v26 = vld [vmem:[#allocation8 + $0x58] sm:$0xff]  ;;  %v157_v28 = vmul.f32 1.442695, %v126_v23  ;;  %417 = vpow2.f32 %v155_v27 }
  0x5b   :  { %v177_v39 = vadd.f32 %v161_v32, %v81_v34  ;;  %v400_v42 = vpop.eup %399  ;;  %v163_v48 = vmul.f32 %v398_v38, %v99_v43  ;;  %v89_v32 = vld [vmem:[#allocation5 + $0x50] sm:$0xff]  ;;  %v107_v38 = vld [vmem:[#allocation8 + $0x60] sm:$0xff] }
  0x5c   :  { %v356_v36 = vpack.c.bf16 %v176_v31, %v175_v29  ;;  %v178_v40 = vadd.f32 %v162_v33, %v82_v35  ;;  %v164_v49 = vmul.f32 %v400_v42, %v100_v44  ;;  %v402_v53 = vpop.eup %401  ;;  %v90_v33 = vld [vmem:[#allocation5 + $0x58] sm:$0xff]  ;;  %419 = vpow2.f32 %v157_v28  ;;  %v91_v43 = vld [vmem:[#allocation5 + $0x60] sm:$0xff]  ;;  %v92_v44 = vld [vmem:[#allocation5 + $0x68] sm:$0xff] }
  0x5d   :  { %v179_v54 = vadd.f32 %v163_v48, %v83_v50  ;;  %v404_v57 = vpop.eup %403  ;;  %v165_v63 = vmul.f32 %v402_v53, %v101_v58  ;;  %v110_v50 = vld [vmem:[#allocation8 + $0x78] sm:$0xff]  ;;  %421 = vpow2.f32 %v269_v61 }
  0x5e   :  { %357 = vmatpush3.bf16.xpose.msra.mxu0 %v356_v36  ;;  %v359_v47 = vpack.c.bf16 %v178_v40, %v177_v39  ;;  %v180_v55 = vadd.f32 %v164_v49, %v84_v51  ;;  %v166_v1 = vmul.f32 %v404_v57, %v102_v59  ;;  %v406_v5 = vpop.eup %405  ;;  %v108_v39 = vld [vmem:[#allocation8 + $0x68] sm:$0xff]  ;;  %v109_v49 = vld [vmem:[#allocation8 + $0x70] sm:$0xff]  ;;  %v192_v59 = vld [vmem:[#allocation2] sm:$0xff] }
  0x5f   :  { %358 = vmatprep.subr.bf16.mxu0 %v547_v0  ;;  %v181_v6 = vadd.f32 %v165_v63, %v85_v2  ;;  %v408_v9 = vpop.eup %407  ;;  %v167_v15 = vmul.f32 %v406_v5, %v103_v10  ;;  %v280_v2 = vlaneseq }
  0x60   :  { %v362_v62 = vpack.c.bf16 %v180_v55, %v179_v54  ;;  %v182_v7 = vadd.f32 %v166_v1, %v86_v3  ;;  %v168_v16 = vmul.f32 %v408_v9, %v104_v11  ;;  %v410_v20 = vpop.eup %409  ;;  %v93_v54 = vld [vmem:[#allocation5 + $0x70] sm:$0xff]  ;;  %v94_v55 = vld [vmem:[#allocation5 + $0x78] sm:$0xff] }
  0x61   :  { %v183_v21 = vadd.f32 %v167_v15, %v87_v17  ;;  %v412_v24 = vpop.eup %411  ;;  %v169_v30 = vmul.f32 %v410_v20, %v105_v25  ;;  %v281_v4 = vshrl.u32 %v280_v2, 7 }
  0x62   :  { %v365_v14 = vpack.c.bf16 %v182_v7, %v181_v6  ;;  %v184_v22 = vadd.f32 %v168_v16, %v88_v18  ;;  %v170_v31 = vmul.f32 %v412_v24, %v106_v26  ;;  %v414_v34 = vpop.eup %413 }
  0x63   :  { %v185_v35 = vadd.f32 %v169_v30, %v89_v32  ;;  %v416_v37 = vpop.eup %415  ;;  %v171_v41 = vmul.f32 %v414_v34, %v107_v38  ;;  %v282_v6 = vsub.s32 0, %v281_v4 }
  0x64   :  { %v368_v29 = vpack.c.bf16 %v184_v22, %v183_v21  ;;  %v186_v36 = vadd.f32 %v170_v31, %v90_v33  ;;  %v172_v42 = vmul.f32 %v416_v37, %v108_v39  ;;  %v418_v45 = vpop.eup %417 }
  0x65   :  { %v187_v46 = vadd.f32 %v171_v41, %v91_v43  ;;  %v173_v52 = vmul.f32 %v418_v45, %v109_v49 }
  0x66   :  { %360 = vmatpush3.bf16.xpose.msra.mxu0 %v359_v47  ;;  %v371_v40 = vpack.c.bf16 %v186_v36, %v185_v35  ;;  %v188_v47 = vadd.f32 %v172_v42, %v92_v44  ;;  %v420_v48 = vpop.eup %419 }
  0x67   :  { %361 = vmatprep.subr.bf16.mxu0 %v547_v0  ;;  %v174_v53 = vmul.f32 %v420_v48, %v110_v50  ;;  %v189_v56 = vadd.f32 %v173_v52, %v93_v54 }
  0x68   :  { %v374_v51 = vpack.c.bf16 %v188_v47, %v187_v46 }
  0x69   :  { %v190_v57 = vadd.f32 %v174_v53, %v94_v55 }
  0x6b   :  { %v377_v58 = vpack.c.bf16 %v190_v57, %v189_v56 }
  0x6e   :  { %363 = vmatpush3.bf16.xpose.msra.mxu0 %v362_v62  ;;  %v422_v62 = vpop.eup %421 }
  0x6f   :  { %364 = vmatprep.subr.bf16.mxu0 %v547_v0  ;;  %v272_v63 = vrot.slane %v422_v62, 7 }
  0x71   :  { %v274_v1 = vmul.f32 %v272_v63, %v268_v60 }
  0x73   :  { %v276_v3 = vrot.slane %v274_v1, 2 }
  0x75   :  { %v278_v5 = vadd.f32 %v276_v3, %v268_v60 }
  0x76   :  { %366 = vmatpush3.bf16.xpose.msra.mxu0 %v365_v14 }
  0x77   :  { %367 = vmatprep.subr.bf16.mxu0 %v547_v0  ;;  %v283_v7 = vrot.slane %v278_v5, %v282_v6 }
  0x7e   :  { %369 = vmatpush3.bf16.xpose.msra.mxu0 %v368_v29 }
  0x7f   :  { %370 = vmatprep.subr.bf16.mxu0 %v547_v0 }
  0x86   :  { %372 = vmatpush3.bf16.xpose.msra.mxu0 %v371_v40 }
  0x87   :  { %373 = vmatprep.subr.bf16.mxu0 %v547_v0 }
  0x8e   :  { %375 = vmatpush3.bf16.xpose.msra.mxu0 %v374_v51 }
  0x8f   :  { %376 = vmatprep.subr.bf16.mxu0 %v547_v0 }
  0x96   :  { %378 = vmatpush3.bf16.xpose.msra.mxu0 %v377_v58 }
  0x9d   :  { %353 = vmatmul.mubr.f32.vlgmr.msra.gmra.mrb[0].mxu0 %v192_v59 }
 0x170   :  { %v259_v0 = vpop.f32.mrb[0].mxu0 }
 0x171   :  { %v354_v8 = vpop.f32.mrb[1].mxu0  ;;  %v284_v9 = vadd.f32 %v283_v7, %v259_v0 }
 0x173   :  { %285 = vst [vmem:[#allocation10] sm:$0xff] %v284_v9 }
 0x174   :  { %522 = shalt.err (!%p519_p8)
}
 0x175   :  { %s523_s19 = scalar_lea.hbm %s666_s5, 128 }
 0x176   :  { %p524_p9 = scmp.ne.s32.totalorder %s666_s5, %s523_s19  ;;  %p527_p10 = scmp.lt.u32.totalorder %s523_s19, %s666_s5 }
 0x178   :  { %p529_p11 = pnand %p527_p10, %p524_p9 }
 0x17a   :  { %532 = shalt.err (!%p529_p11)
}
 0x17b   :  { %295 = dma.vmem_to_hbm [thread:$0]  %s293_s17, 128, %s666_s5, [#allocation4]  }
 0x17c   :  { %539 = dma.done.wait [#allocation4], 128  }
 0x17d   :  { %540 = vsyncadd [#allocation4], 4294967168 }
 0x17e   :  { %299 = vsyncpa [#allocation3], 1 }
 0x17f   :  { %300 = vsyncpa [#allocation6], 1 }
 0x180   :  { %301 = vsyncpa [#allocation9], 1 }
 0x181   :  { %302 = vsyncpa [#allocation4], 1 }

</bundles_post_ra>
